<compile_context>
chip_gen: v5e
topology: v5e:2x2
jax: 0.10.0
libtpu: 0.0.40
codegen_flags: <defaults>
</compile_context>

<pallas_src>
import math
import jax
import jax.numpy as jnp
from jax.experimental import pallas as pl
from jax.experimental.pallas import tpu as pltpu


def mlp_kernel(x_ref, w1_ref, b1_ref, w2_ref, b2_ref, w3_ref, b3_ref, o_ref):
    # x_ref: (1, Cin, tL).  Weights arrive already in the compute dtype
    # (pre-cast once in the wrapper).  Biases are f32, added post-accumulation.
    cdt = w1_ref.dtype
    x = x_ref[0].astype(cdt)                                        # (Cin, tL)

    # layer 1: (256, Cin) @ (Cin, tL) -> relu        (f32 accumulate)
    h = jnp.dot(w1_ref[...], x, preferred_element_type=jnp.float32)
    h = jnp.maximum(h + b1_ref[...], 0.0)                           # (256, tL)

    # layer 2: (64, 256) @ (256, tL) -> relu
    h = jnp.dot(w2_ref[...], h.astype(cdt), preferred_element_type=jnp.float32)
    h = jnp.maximum(h + b2_ref[...], 0.0)                           # (64, tL)

    # layer 3: (Cout, 64) @ (64, tL) -> relu
    h = jnp.dot(w3_ref[...], h.astype(cdt), preferred_element_type=jnp.float32)
    h = jnp.maximum(h + b3_ref[...], 0.0)                           # (Cout, tL)

    o_ref[0] = h.astype(o_ref.dtype)


def _choose_tiling(L, requested):
    """Pick (tile_l, padded_L).  Prefers a 128-multiple tile that divides the
    128-aligned L so no wrapper-level pad copy / output slice is needed."""
    lane = 128
    L_128 = pl.cdiv(L, lane) * lane          # minimal lane alignment
    requested = max(lane, min(int(requested), L_128))
    divisor_tile = max(t for t in range(lane, requested + 1, lane)
                       if L_128 % t == 0)
    if divisor_tile * 4 >= requested:
        # A divisor tile close enough to the request: zero extra padding.
        return divisor_tile, L_128
    # Ragged L: pad to the requested tile (pad copy cheaper than tiny tiles).
    return requested, pl.cdiv(L_128, requested) * requested


def mlp_pallas(x_ncl, params, *, tile_l=2048, compute_dtype=jnp.bfloat16,
               out_dtype=jnp.float32, vmem_limit_bytes=None):
    """x_ncl: (B, in_num, L) float32.  Returns (B, out_num, L) in out_dtype."""
    w1, b1, w2, b2, w3, b3 = params
    B, Cin, L = x_ncl.shape
    H1, H2, Cout = w1.shape[0], w2.shape[0], w3.shape[0]

    # Pre-cast weights ONCE outside the kernel (bf16 MXU inputs by default).
    if compute_dtype != jnp.float32:
        w1c, w2c, w3c = (w.astype(compute_dtype) for w in (w1, w2, w3))
    else:
        w1c, w2c, w3c = w1, w2, w3

    tile_l, L_p = _choose_tiling(L, tile_l)

    # Keep >= 2 L blocks when B == 1 so both v7x TensorCores get work.
    if B == 1 and L_p // tile_l < 2 and tile_l % 256 == 0:
        tile_l //= 2

    if L_p != L:
        # Padded columns compute relu(bias) garbage; sliced off below.
        x_ncl = jnp.pad(x_ncl, ((0, 0), (0, 0), (0, L_p - L)))

    grid = (B, L_p // tile_l)

    flops = 2 * B * L_p * (Cin * H1 + H1 * H2 + H2 * Cout)
    bytes_accessed = (int(x_ncl.size) * 4
                      + B * Cout * L_p * jnp.dtype(out_dtype).itemsize
                      + sum(int(w.size) * w.dtype.itemsize
                            for w in (w1c, w2c, w3c))
                      + sum(int(b.size) * 4 for b in (b1, b2, b3)))
    cost = pl.CostEstimate(flops=int(flops), transcendentals=0,
                           bytes_accessed=int(bytes_accessed))

    out = pl.pallas_call(
        mlp_kernel,
        out_shape=jax.ShapeDtypeStruct((B, Cout, L_p), out_dtype),
        grid_spec=pltpu.PrefetchScalarGridSpec(
            num_scalar_prefetch=0,
            grid=grid,
            in_specs=[
                pl.BlockSpec((1, Cin, tile_l), lambda b, l: (b, 0, l)),  # x tile
                pl.BlockSpec(w1c.shape, lambda b, l: (0, 0)),            # w1 (256, Cin)
                pl.BlockSpec(b1.shape, lambda b, l: (0, 0)),             # b1 (256, 1)
                pl.BlockSpec(w2c.shape, lambda b, l: (0, 0)),            # w2 (64, 256)
                pl.BlockSpec(b2.shape, lambda b, l: (0, 0)),             # b2 (64, 1)
                pl.BlockSpec(w3c.shape, lambda b, l: (0, 0)),            # w3 (Cout, 64)
                pl.BlockSpec(b3.shape, lambda b, l: (0, 0)),             # b3 (Cout, 1)
            ],
            out_specs=pl.BlockSpec((1, Cout, tile_l), lambda b, l: (b, 0, l)),
        ),
        compiler_params=pltpu.CompilerParams(
            dimension_semantics=("parallel", "parallel"),
            vmem_limit_bytes=vmem_limit_bytes),
        cost_estimate=cost,
    )(x_ncl, w1c, b1, w2c, b2, w3c, b3)

    if L_p != L:
        out = out[:, :, :L]
    return out


def init_params(key, in_num, out_num):
    """Deterministic init mimicking PyTorch Conv1d default (U[-1/sqrt(fan_in), ..]).

    Weights stored as (out_channels, in_channels) — the natural Conv1d(k=1)
    layout — and biases as (out_channels, 1) so they broadcast over L (lanes).
    """
    def layer(k, cin, cout):
        kw, kb = jax.random.split(k)
        bound = 1.0 / math.sqrt(cin)
        w = jax.random.uniform(kw, (cout, cin), jnp.float32, -bound, bound)
        b = jax.random.uniform(kb, (cout, 1), jnp.float32, -bound, bound)
        return w, b

    k1, k2, k3 = jax.random.split(key, 3)
    w1, b1 = layer(k1, in_num, 256)
    w2, b2 = layer(k2, 256, 64)
    w3, b3 = layer(k3, 64, out_num)
    return (w1, b1, w2, b2, w3, b3)


def mlp_ref(x_ncl, params):
    """Pure-JAX reference matching the PyTorch forward exactly (f32)."""
    w1, b1, w2, b2, w3, b3 = params
    h = jax.nn.relu(jnp.einsum('oi,bil->bol', w1, x_ncl) + b1[None])
    h = jax.nn.relu(jnp.einsum('oi,bil->bol', w2, h) + b2[None])
    h = jax.nn.relu(jnp.einsum('oi,bil->bol', w3, h) + b3[None])
    return h


if __name__ == "__main__":
    key = jax.random.PRNGKey(0)
    k_x, k_p, k_x2 = jax.random.split(key, 3)

    B, in_num, out_num, L = 2, 16, 32, 256   # NCL Conv1d input
    x = jax.random.normal(k_x, (B, in_num, L), jnp.float32)
    params = init_params(k_p, in_num, out_num)
    ref = mlp_ref(x, params)

    # Default (bf16 MXU inputs, f32 accumulate + epilogue, f32 output).
    out_bf16 = jax.block_until_ready(mlp_pallas(x, params))
    assert out_bf16.shape == (B, out_num, L), out_bf16.shape
    assert jnp.allclose(out_bf16, ref, atol=5e-2, rtol=5e-2), "bf16 mismatch vs reference"

    # f32 compute path: tight (relative-error) check vs the reference.
    out_f32 = jax.block_until_ready(mlp_pallas(x, params, compute_dtype=jnp.float32))
    assert out_f32.shape == (B, out_num, L), out_f32.shape
    rel = jnp.max(jnp.abs(out_f32 - ref)) / (jnp.max(jnp.abs(ref)) + 1e-12)
    assert rel < 1e-5, f"f32 mismatch vs reference (rel={rel})"

    # Ragged-L + B==1 path (exercises lane padding, slice-off, and the >=2
    # L-block split for megacore).
    L2 = 200
    x2 = jax.random.normal(k_x2, (1, in_num, L2), jnp.float32)
    ref2 = mlp_ref(x2, params)
    out2 = jax.block_until_ready(mlp_pallas(x2, params))
    assert out2.shape == (1, out_num, L2), out2.shape
    assert jnp.allclose(out2, ref2, atol=5e-2, rtol=5e-2), "ragged-L mismatch vs reference"

    print("KERNEL_OK")
</pallas_src>

<mosaic_0001>
module attributes {stable_mosaic.version = 11 : i64} {
  func.func @mlp_kernel(%arg0: i32, %arg1: i32, %arg2: memref<1x16x256xf32, #tpu.memory_space<vmem>>, %arg3: memref<256x16xbf16, #tpu.memory_space<vmem>>, %arg4: memref<256x1xf32, #tpu.memory_space<vmem>>, %arg5: memref<64x256xbf16, #tpu.memory_space<vmem>>, %arg6: memref<64x1xf32, #tpu.memory_space<vmem>>, %arg7: memref<32x64xbf16, #tpu.memory_space<vmem>>, %arg8: memref<32x1xf32, #tpu.memory_space<vmem>>, %arg9: memref<1x32x256xf32, #tpu.memory_space<vmem>>) attributes {dimension_semantics = [#tpu.dimension_semantics<parallel>, #tpu.dimension_semantics<parallel>], iteration_bounds = array<i64: 2, 1>, scalar_prefetch = 0 : i64, scratch_operands = 0 : i64, tpu.core_type = #tpu.core_type<tc>, window_params = [{transform_indices = @transform_0, window_bounds = array<i64: 1, 16, 256>}, {pipeline_mode = #tpu.pipeline_mode<synchronous>, transform_indices = @transform_1, window_bounds = array<i64: 256, 16>}, {pipeline_mode = #tpu.pipeline_mode<synchronous>, transform_indices = @transform_2, window_bounds = array<i64: 256, 1>}, {pipeline_mode = #tpu.pipeline_mode<synchronous>, transform_indices = @transform_3, window_bounds = array<i64: 64, 256>}, {pipeline_mode = #tpu.pipeline_mode<synchronous>, transform_indices = @transform_4, window_bounds = array<i64: 64, 1>}, {pipeline_mode = #tpu.pipeline_mode<synchronous>, transform_indices = @transform_5, window_bounds = array<i64: 32, 64>}, {pipeline_mode = #tpu.pipeline_mode<synchronous>, transform_indices = @transform_6, window_bounds = array<i64: 32, 1>}, {transform_indices = @transform_7, window_bounds = array<i64: 1, 32, 256>}]} {
    %c0 = arith.constant 0 : index
    %c0_0 = arith.constant 0 : index
    %c0_1 = arith.constant 0 : index
    %0 = vector.load %arg2[%c0, %c0_0, %c0_1] : memref<1x16x256xf32, #tpu.memory_space<vmem>>, vector<1x16x256xf32>
    %1 = vector.shape_cast %0 : vector<1x16x256xf32> to vector<16x256xf32>
    %2 = arith.truncf %1 : vector<16x256xf32> to vector<16x256xbf16>
    %c0_2 = arith.constant 0 : index
    %c0_3 = arith.constant 0 : index
    %3 = vector.load %arg3[%c0_2, %c0_3] : memref<256x16xbf16, #tpu.memory_space<vmem>>, vector<256x16xbf16>
    %cst = arith.constant dense<0.000000e+00> : vector<256x256xf32>
    %4 = tpu.matmul %3, %2, %cst {dimension_numbers = #tpu.dot_dimension_numbers<[1], [0], [0], [1], [0, 0, 1, 1], [], []>} : vector<256x16xbf16>, vector<16x256xbf16>, vector<256x256xf32> -> vector<256x256xf32>
    %c0_4 = arith.constant 0 : index
    %c0_5 = arith.constant 0 : index
    %5 = vector.load %arg4[%c0_4, %c0_5] : memref<256x1xf32, #tpu.memory_space<vmem>>, vector<256x1xf32>
    %6 = vector.broadcast %5 : vector<256x1xf32> to vector<256x256xf32>
    %7 = arith.addf %4, %6 : vector<256x256xf32>
    %cst_6 = arith.constant 0.000000e+00 : f32
    %8 = vector.broadcast %cst_6 : f32 to vector<256x256xf32>
    %9 = arith.maximumf %7, %8 : vector<256x256xf32>
    %c0_7 = arith.constant 0 : index
    %c0_8 = arith.constant 0 : index
    %10 = vector.load %arg5[%c0_7, %c0_8] : memref<64x256xbf16, #tpu.memory_space<vmem>>, vector<64x256xbf16>
    %11 = arith.truncf %9 : vector<256x256xf32> to vector<256x256xbf16>
    %cst_9 = arith.constant dense<0.000000e+00> : vector<64x256xf32>
    %12 = tpu.matmul %10, %11, %cst_9 {dimension_numbers = #tpu.dot_dimension_numbers<[1], [0], [0], [1], [0, 0, 1, 1], [], []>} : vector<64x256xbf16>, vector<256x256xbf16>, vector<64x256xf32> -> vector<64x256xf32>
    %c0_10 = arith.constant 0 : index
    %c0_11 = arith.constant 0 : index
    %13 = vector.load %arg6[%c0_10, %c0_11] : memref<64x1xf32, #tpu.memory_space<vmem>>, vector<64x1xf32>
    %14 = vector.broadcast %13 : vector<64x1xf32> to vector<64x256xf32>
    %15 = arith.addf %12, %14 : vector<64x256xf32>
    %cst_12 = arith.constant 0.000000e+00 : f32
    %16 = vector.broadcast %cst_12 : f32 to vector<64x256xf32>
    %17 = arith.maximumf %15, %16 : vector<64x256xf32>
    %c0_13 = arith.constant 0 : index
    %c0_14 = arith.constant 0 : index
    %18 = vector.load %arg7[%c0_13, %c0_14] : memref<32x64xbf16, #tpu.memory_space<vmem>>, vector<32x64xbf16>
    %19 = arith.truncf %17 : vector<64x256xf32> to vector<64x256xbf16>
    %cst_15 = arith.constant dense<0.000000e+00> : vector<32x256xf32>
    %20 = tpu.matmul %18, %19, %cst_15 {dimension_numbers = #tpu.dot_dimension_numbers<[1], [0], [0], [1], [0, 0, 1, 1], [], []>} : vector<32x64xbf16>, vector<64x256xbf16>, vector<32x256xf32> -> vector<32x256xf32>
    %c0_16 = arith.constant 0 : index
    %c0_17 = arith.constant 0 : index
    %21 = vector.load %arg8[%c0_16, %c0_17] : memref<32x1xf32, #tpu.memory_space<vmem>>, vector<32x1xf32>
    %22 = vector.broadcast %21 : vector<32x1xf32> to vector<32x256xf32>
    %23 = arith.addf %20, %22 : vector<32x256xf32>
    %cst_18 = arith.constant 0.000000e+00 : f32
    %24 = vector.broadcast %cst_18 : f32 to vector<32x256xf32>
    %25 = arith.maximumf %23, %24 : vector<32x256xf32>
    %c0_19 = arith.constant 0 : index
    %c0_20 = arith.constant 0 : index
    %c0_21 = arith.constant 0 : index
    %26 = vector.load %arg9[%c0_19, %c0_20, %c0_21] : memref<1x32x256xf32, #tpu.memory_space<vmem>>, vector<1x32x256xf32>
    %27 = vector.shape_cast %26 : vector<1x32x256xf32> to vector<32x256xf32>
    %28 = vector.shape_cast %25 : vector<32x256xf32> to vector<1x32x256xf32>
    tpu.vector_store %arg9[%c0_19, %c0_20, %c0_21], %28 {strides = array<i32>} : memref<1x32x256xf32, #tpu.memory_space<vmem>>, vector<1x32x256xf32>,
    return
  }
  func.func @transform_0(%arg0: i32, %arg1: i32) -> (i32, i32, i32) {
    %c0_i32 = arith.constant 0 : i32
    %c0_i32_0 = arith.constant 0 : i32
    return %arg0, %c0_i32, %arg1 : i32, i32, i32
  }
  func.func @transform_1(%arg0: i32, %arg1: i32) -> (i32, i32) {
    %c0_i32 = arith.constant 0 : i32
    %c0_i32_0 = arith.constant 0 : i32
    %c0_i32_1 = arith.constant 0 : i32
    return %c0_i32, %c0_i32_0 : i32, i32
  }
  func.func @transform_2(%arg0: i32, %arg1: i32) -> (i32, i32) {
    %c0_i32 = arith.constant 0 : i32
    %c0_i32_0 = arith.constant 0 : i32
    %c0_i32_1 = arith.constant 0 : i32
    return %c0_i32, %c0_i32_0 : i32, i32
  }
  func.func @transform_3(%arg0: i32, %arg1: i32) -> (i32, i32) {
    %c0_i32 = arith.constant 0 : i32
    %c0_i32_0 = arith.constant 0 : i32
    %c0_i32_1 = arith.constant 0 : i32
    return %c0_i32, %c0_i32_0 : i32, i32
  }
  func.func @transform_4(%arg0: i32, %arg1: i32) -> (i32, i32) {
    %c0_i32 = arith.constant 0 : i32
    %c0_i32_0 = arith.constant 0 : i32
    %c0_i32_1 = arith.constant 0 : i32
    return %c0_i32, %c0_i32_0 : i32, i32
  }
  func.func @transform_5(%arg0: i32, %arg1: i32) -> (i32, i32) {
    %c0_i32 = arith.constant 0 : i32
    %c0_i32_0 = arith.constant 0 : i32
    %c0_i32_1 = arith.constant 0 : i32
    return %c0_i32, %c0_i32_0 : i32, i32
  }
  func.func @transform_6(%arg0: i32, %arg1: i32) -> (i32, i32) {
    %c0_i32 = arith.constant 0 : i32
    %c0_i32_0 = arith.constant 0 : i32
    %c0_i32_1 = arith.constant 0 : i32
    return %c0_i32, %c0_i32_0 : i32, i32
  }
  func.func @transform_7(%arg0: i32, %arg1: i32) -> (i32, i32, i32) {
    %c0_i32 = arith.constant 0 : i32
    %c0_i32_0 = arith.constant 0 : i32
    return %arg0, %c0_i32, %arg1 : i32, i32, i32
  }
}

</mosaic_0001>

<bundles_post_ra>
// kernel: tpu_custom_call.1
= control target key start
LH: loop header
LB: loop body
LE: loop exit
PB: predicated region body
PF: predicated region fallthrough
CT: control target
= control target key end

     0   :  { %12 = vsyncpa [#allocation3], 0  ;;  %s2325_s0 = inlined_call_operand.vmem [shape: f32[2,16,256], index: 0, kind: input, shape index: {}]   ;;  %s2326_s1 = inlined_call_operand.vmem [shape: bf16[256,16], index: 1, kind: input, shape index: {}]   ;;  %s2327_s2 = inlined_call_operand.vmem [shape: f32[256,1], index: 2, kind: input, shape index: {}]   ;;  %s2328_s3 = inlined_call_operand.vmem [shape: bf16[64,256], index: 3, kind: input, shape index: {}]   ;;  %s2329_s4 = inlined_call_operand.vmem [shape: f32[64,1], index: 4, kind: input, shape index: {}]   ;;  %s2330_s5 = inlined_call_operand.vmem [shape: bf16[32,64], index: 5, kind: input, shape index: {}]   ;;  %s2331_s6 = inlined_call_operand.vmem [shape: f32[32,1], index: 6, kind: input, shape index: {}]   ;;  %s2332_s7 = inlined_call_operand.hbm [shape: f32[2,32,256], index: 7, kind: output, shape index: {}]  }
   0x1   :  { %14 = vsyncpa [#allocation3 + $0x1], 0  ;;  %s1741_s24 = smov 0   ;;  %s1743_s25 = smov 0  }
   0x2   :  { %s1745_s26 = smov 0   ;;  %s1747_s27 = smov 0  }
   0x3   :  { %s1749_s28 = smov 0   ;;  %s1751_s29 = smov 0  }
   0x4 LB: > { %s1374_s30 = sadd.s32 4294967295, %s1696_s29   ;;  %s1375_s8 = sadd.s32 4294967294, %s1696_s29   ;;  %s1696_s29 = sphi %s1751_s29, %s20_s29   ;;  %s1692_s28 = sphi %s1749_s28, %s2342_s28   ;;  %s1688_s27 = sphi %s1747_s27, %s2341_s27   ;;  %s1684_s26 = sphi %s1745_s26, %s2340_s26   ;;  %s1680_s25 = sphi %s1743_s25, %s2339_s25   ;;  %s1676_s24 = sphi %s1741_s24, %s2338_s24  }
   0x5   : > { %s32_s9 = sadd.s32 1, %s1692_s28  ;;  %s195_s10 = sadd.s32 1, %s1684_s26 }
   0x6   : > { %p34_p0 = scmp.ge.s32.totalorder %s32_s9, 2  ;;  %p205_p1 = scmp.ne.s32.totalorder %s1684_s26, %s1680_s25 }
   0x7   : > { %p206_p2 = scmp.eq.s32.totalorder %s1374_s30, 1  ;;  %p211_p3 = scmp.ne.s32.totalorder %s1680_s25, %s1676_s24 }
   0x8   : > { %s2344_s9 = smov (%p34_p0, %s32_s9), 0  ;;  %p212_p5 = scmp.eq.s32.totalorder %s1375_s8, 1 }
   0x9   : > { %p1781_p4 = por %p206_p2, %p205_p1  ;;  %s190_s12 = ssub.s32 %s1692_s28, %s2344_s9 }
   0xa   : > { %p1378_p6 = scmp.ge.s32.totalorder %s1696_s29, 1  ;;  %p193_p7 = scmp.eq.s32.totalorder %s190_s12, 0 }
   0xb   : > { %p1788_p8 = por %p212_p5, %p211_p3  ;;  %p261_p9 = scmp.lt.s32.totalorder %s1696_s29, 3 }
   0xc   : > { %s1794_s14 = scalar_select %p193_p7, %s1684_s26, %s195_s10  }
   0xd   : > { %p262_p10 = pnand %p1378_p6, %p261_p9 }
   0xf   : > { %265 = sbr.rel (%p262_p10) target bundleno = 840 (0x348), region = 48 }
  0x14   : > { %v377_v0 = vld [vmem:[%s2327_s2 + $0xf0] sm:$0xff]  ;;  %v359_v2 = vld [vmem:[%s2327_s2 + $0x60] sm:$0xff]  ;;  %p298_p11 = scmp.lt.s32.totalorder %s1688_s27, 1  ;;  %v1698_v3 = vmov 0   ;;  %v378_v9 = vld [vmem:[%s2327_s2 + $0xf8] sm:$0xff]  ;;  %vm619_vm0 = vcmask 130048  }
  0x15   : > { %v361_v1 = vld [vmem:[%s2327_s2 + $0x70] sm:$0xff]  ;;  %1617 = vset.pattern.permute.xlu2 %v1698_v3  ;;  %1616 = vset.pattern.permute.xlu1 %v1698_v3  ;;  %v362_v11 = vld [vmem:[%s2327_s2 + $0x78] sm:$0xff]  ;;  %v360_v12 = vld [vmem:[%s2327_s2 + $0x68] sm:$0xff]  ;;  %vm1216_vm1 = vcmask 523264   ;;  %s294_s20 = sand.u32 1, %s1680_s25   ;;  %s1554_s23 = sshll.u32 %s1688_s27, 6 }
  0x16   : > { %1615 = vset.pattern.permute.xlu0 %v1698_v3  ;;  %531 = vperm.xlu1 %1616, %v377_v0   ;;  %s299_s21 = scalar_select %p298_p11, %s1688_s27, 1  ;;  %v1528_v13 = vld [vmem:[%s2326_s1] sm:$0xff]  ;;  %v376_v14 = vld [vmem:[%s2327_s2 + $0xe8] sm:$0xff]  ;;  %v357_v16 = vld [vmem:[%s2327_s2 + $0x50] sm:$0xff] }
  0x17   : > { %451 = vperm.xlu0 %1615, %v361_v1   ;;  %441 = vperm.xlu2 %1617, %v359_v2   ;;  %v375_v15 = vld [vmem:[%s2327_s2 + $0xe0] sm:$0xff]  ;;  %v373_v17 = vld [vmem:[%s2327_s2 + $0xd0] sm:$0xff]  ;;  %v358_v18 = vld [vmem:[%s2327_s2 + $0x58] sm:$0xff]  ;;  %s1291_s10 = scalar_lea.hbm %s2332_s7, %s1554_s23  ;;  %s1278_s16 = scalar_lea.sflag [#allocation3], %s294_s20 }
  0x18   : > { %s1527_s22 = sshll.u32 %s299_s21, 5  ;;  %v374_v19 = vld [vmem:[%s2327_s2 + $0xd8] sm:$0xff]  ;;  %v1529_v20 = vld [vmem:[%s2326_s1 + $0x8] sm:$0xff]  ;;  %v371_v22 = vld [vmem:[%s2327_s2 + $0xc0] sm:$0xff]  ;;  %s1379_s21 = sshll.u32 %s294_s20, 6 }
  0x19   : > { %s305_s8 = scalar_lea.vmem %s2325_s0, %s1527_s22  ;;  %v356_v21 = vld [vmem:[%s2327_s2 + $0x48] sm:$0xff]  ;;  %v355_v23 = vld [vmem:[%s2327_s2 + $0x40] sm:$0xff]  ;;  %v353_v24 = vld [vmem:[%s2327_s2 + $0x30] sm:$0xff]  ;;  %s2276_s22 = scalar_lea.vmem [#allocation2], %s1379_s21 }
  0x1a   : > { %v309_v4 = vld [vmem:[%s305_s8] sm:$0xff]  ;;  %v311_v5 = vld [vmem:[%s305_s8 + $0x10] sm:$0xff]  ;;  %v310_v6 = vld [vmem:[%s305_s8 + $0x8] sm:$0xff]  ;;  %s1292_s12 = sshll.u32 %s2276_s22, 4  ;;  %s1294_s15 = sshll.u32 %s1291_s10, 4  ;;  %s1293_s12 = int_to_ptr.vmem [resolvable:$true] %s1292_s12  ;;  %s1295_s15 = int_to_ptr.hbm [resolvable:$true] %s1294_s15 }
  0x1b   : > { %v313_v7 = vpack.c.bf16 %v311_v5, %v309_v4  ;;  %v312_v8 = vld [vmem:[%s305_s8 + $0x18] sm:$0xff]  ;;  %v372_v25 = vld [vmem:[%s2327_s2 + $0xc8] sm:$0xff]  ;;  %v1530_v27 = vld [vmem:[%s2326_s1 + $0x10] sm:$0xff]  ;;  %s1632_s17 = sshra.s32 %s1295_s15, 4  ;;  %s1638_s21 = scalar_lea.hbm %s2332_s7, 128  ;;  %s1633_s17 = int_to_ptr.hbm [resolvable:$true] %s1632_s17 }
  0x1c   : > { %v314_v10 = vpack.c.bf16 %v312_v8, %v310_v6  ;;  %v354_v26 = vld [vmem:[%s2327_s2 + $0x38] sm:$0xff]  ;;  %v369_v29 = vld [vmem:[%s2327_s2 + $0xb0] sm:$0xff]  ;;  %v351_v30 = vld [vmem:[%s2327_s2 + $0x20] sm:$0xff]  ;;  %s1634_s27 = scalar_lea.hbm %s1633_s17, 64  ;;  %p1639_p1 = scmp.lt.s32.totalorder %s1633_s17, %s2332_s7 }
  0x1d   : > { %675 = vmatpush.bf16.msra.mxu0 %v313_v7  ;;  %1555 = vmatpush.bf16.msra.mxu2 %v313_v7  ;;  %v370_v28 = vld [vmem:[%s2327_s2 + $0xb8] sm:$0xff]  ;;  %v367_v31 = vld [vmem:[%s2327_s2 + $0xa0] sm:$0xff]  ;;  %v352_v32 = vld [vmem:[%s2327_s2 + $0x28] sm:$0xff]  ;;  %p1635_p12 = scmp.ne.s32.totalorder %s1633_s17, %s1634_s27  ;;  %p1640_p2 = scmp.lt.s32.totalorder %s1638_s21, %s1634_s27 }
  0x1e   : > { %764 = vmatpush.bf16.msra.mxu1 %v314_v10  ;;  %536 = vperm.xlu1 %1616, %v378_v9   ;;  %v368_v33 = vld [vmem:[%s2327_s2 + $0xa8] sm:$0xff]  ;;  %v1531_v34 = vld [vmem:[%s2326_s1 + $0x18] sm:$0xff]  ;;  %v365_v36 = vld [vmem:[%s2327_s2 + $0x90] sm:$0xff] }
  0x1f   : > { %456 = vperm.xlu0 %1615, %v362_v11   ;;  %446 = vperm.xlu2 %1617, %v360_v12   ;;  %v350_v35 = vld [vmem:[%s2327_s2 + $0x18] sm:$0xff]  ;;  %v349_v37 = vld [vmem:[%s2327_s2 + $0x10] sm:$0xff]  ;;  %v347_v38 = vld [vmem:[%s2327_s2] sm:$0xff]  ;;  %p1636_p13 = pnand %p1635_p12, %p1781_p4  ;;  %p1641_p3 = por %p1640_p2, %p1639_p1 }
  0x20   : > { %1446 = vmatmul.msk.bf16.vlgmr.msra.gmra.mxu0 %vm619_vm0, %v1528_v13  ;;  %1556 = vmatpush.bf16.msra.mxu3 %v314_v10  ;;  %v348_v39 = vld [vmem:[%s2327_s2 + $0x8] sm:$0xff]  ;;  %v1532_v40 = vld [vmem:[%s2326_s1 + $0x20] sm:$0xff]  ;;  %v1542_v44 = vld [vmem:[%s2326_s1 + $0x70] sm:$0xff] }
  0x21   : > { %1462 = vmatmul.msk.bf16.vlgmr.msra.gmra.mxu1 %vm619_vm0, %v1528_v13  ;;  %v1916_v41 = vld [vmem:[%s2326_s1 + $0x68] sm:$0xff]  ;;  %1460 = vmatmul.msk.bf16.vlgmr.msra.gmra.mxu2 %vm619_vm0, %v1542_v44  ;;  %v1534_v46 = vld [vmem:[%s2326_s1 + $0x30] sm:$0xff]  ;;  %v366_v47 = vld [vmem:[%s2327_s2 + $0x98] sm:$0xff]  ;;  %p1637_p0 = pneg %p1636_p13 }
  0x22   : > { %v1533_v42 = vld [vmem:[%s2326_s1 + $0x28] sm:$0xff]  ;;  %v363_v49 = vld [vmem:[%s2327_s2 + $0x80] sm:$0xff]  ;;  %v1543_v53 = vld [vmem:[%s2326_s1 + $0x78] sm:$0xff] }
  0x23   : > { %1475 = vmatmul.msk.bf16.vlgmr.msra.gmra.mxu3 %vm619_vm0, %v1916_v41  ;;  %v364_v50 = vld [vmem:[%s2327_s2 + $0x88] sm:$0xff]  ;;  %v1535_v54 = vld [vmem:[%s2326_s1 + $0x38] sm:$0xff]  ;;  %v954_v56 = vld [vmem:[%s2329_s4 + $0x20] sm:$0xff]  ;;  %p1642_p5 = pnand %p1641_p3, %p1637_p0 }
  0x24   : > { %v957_v55 = vld [vmem:[%s2329_s4 + $0x38] sm:$0xff]  ;;  %v952_v60 = vld [vmem:[%s2329_s4 + $0x10] sm:$0xff]  ;;  %v1536_v1 = vld [vmem:[%s2326_s1 + $0x40] sm:$0xff] }
  0x25   : > { %v953_v61 = vld [vmem:[%s2329_s4 + $0x18] sm:$0xff]  ;;  %v951_v4 = vld [vmem:[%s2329_s4 + $0x8] sm:$0xff]  ;;  %v1182_v5 = vld [vmem:[%s2331_s6] sm:$0xff] }
  0x26   : > { %526 = vperm.xlu1 %1616, %v376_v14   ;;  %v1184_v11 = vld [vmem:[%s2331_s6 + $0x10] sm:$0xff]  ;;  %v1185_v12 = vld [vmem:[%s2331_s6 + $0x18] sm:$0xff] }
  0x27   : > { %521 = vperm.xlu0 %1615, %v375_v15   ;;  %431 = vperm.xlu2 %1617, %v357_v16   ;;  %v1537_v15 = vld [vmem:[%s2326_s1 + $0x48] sm:$0xff]  ;;  %v956_v16 = vld [vmem:[%s2329_s4 + $0x30] sm:$0xff] }
  0x2e   : > { %511 = vperm.xlu1 %1616, %v373_v17  }
  0x2f   : > { %436 = vperm.xlu0 %1615, %v358_v18   ;;  %516 = vperm.xlu2 %1617, %v374_v19  }
  0x30   : > { %1447 = vmatmul.msk.bf16.gmra.mxu0 %vm619_vm0, %v1529_v20 }
  0x31   : > { %1463 = vmatmul.msk.bf16.gmra.mxu1 %vm619_vm0, %v1529_v20  ;;  %1461 = vmatmul.msk.bf16.gmra.mxu2 %vm619_vm0, %v1543_v53 }
  0x33   : > { %1476 = vmatmul.msk.bf16.gmra.mxu3 %vm619_vm0, %v1542_v44 }
  0x36   : > { %426 = vperm.xlu1 %1616, %v356_v21  }
  0x37   : > { %501 = vperm.xlu2 %1617, %v371_v22   ;;  %421 = vperm.xlu0 %1615, %v355_v23   ;;  %v955_v22 = vld [vmem:[%s2329_s4 + $0x28] sm:$0xff] }
  0x3e   : > { %411 = vperm.xlu1 %1616, %v353_v24  }
  0x3f   : > { %506 = vperm.xlu0 %1615, %v372_v25   ;;  %416 = vperm.xlu2 %1617, %v354_v26  }
  0x40   : > { %1448 = vmatmul.msk.bf16.gmra.mxu0 %vm619_vm0, %v1530_v27 }
  0x41   : > { %1464 = vmatmul.msk.bf16.gmra.mxu1 %vm619_vm0, %v1530_v27 }
  0x43   : > { %1477 = vmatmul.msk.bf16.gmra.mxu3 %vm619_vm0, %v1543_v53 }
  0x46   : > { %496 = vperm.xlu1 %1616, %v370_v28   ;;  %v950_v28 = vld [vmem:[%s2329_s4] sm:$0xff] }
  0x47   : > { %491 = vperm.xlu0 %1615, %v369_v29   ;;  %401 = vperm.xlu2 %1617, %v351_v30   ;;  %v1538_v29 = vld [vmem:[%s2326_s1 + $0x50] sm:$0xff] }
  0x4e   : > { %481 = vperm.xlu1 %1616, %v367_v31  }
  0x4f   : > { %406 = vperm.xlu0 %1615, %v352_v32   ;;  %486 = vperm.xlu2 %1617, %v368_v33  }
  0x50   : > { %1449 = vmatmul.msk.bf16.gmra.mxu0 %vm619_vm0, %v1531_v34 }
  0x51   : > { %1465 = vmatmul.msk.bf16.gmra.mxu1 %vm619_vm0, %v1531_v34 }
  0x56   : > { %396 = vperm.xlu1 %1616, %v350_v35   ;;  %v1183_v35 = vld [vmem:[%s2331_s6 + $0x8] sm:$0xff] }
  0x57   : > { %471 = vperm.xlu2 %1617, %v365_v36   ;;  %391 = vperm.xlu0 %1615, %v349_v37  }
  0x5e   : > { %381 = vperm.xlu1 %1616, %v347_v38  }
  0x5f   : > { %386 = vperm.xlu2 %1617, %v348_v39   ;;  %476 = vperm.xlu0 %1615, %v366_v47  }
  0x60   : > { %1450 = vmatmul.msk.bf16.gmra.mxu0 %vm619_vm0, %v1532_v40 }
  0x61   : > { %1466 = vmatmul.msk.bf16.gmra.mxu1 %vm619_vm0, %v1532_v40 }
  0x66   : > { %466 = vperm.xlu1 %1616, %v364_v50  }
  0x67   : > { %461 = vperm.xlu0 %1615, %v363_v49   ;;  %990 = vperm.xlu2 %1617, %v956_v16  }
  0x6e   : > { %980 = vperm.xlu1 %1616, %v954_v56  }
  0x6f   : > { %995 = vperm.xlu0 %1615, %v957_v55   ;;  %985 = vperm.xlu2 %1617, %v955_v22  }
  0x70   : > { %1451 = vmatmul.msk.bf16.gmra.mxu0 %vm619_vm0, %v1533_v42 }
  0x71   : > { %v1924_v43 = vpop.permute.xlu2 %441  ;;  %1467 = vmatmul.msk.bf16.gmra.mxu1 %vm619_vm0, %v1533_v42 }
  0x76   : > { %975 = vperm.xlu1 %1616, %v953_v61  }
  0x77   : > { %970 = vperm.xlu0 %1615, %v952_v60   ;;  %960 = vperm.xlu2 %1617, %v950_v28  }
  0x79   : > { %v1930_v45 = vpop.permute.xlu2 %446 }
  0x7e   : > { %1188 = vperm.xlu1 %1616, %v1182_v5   ;;  %v1539_v5 = vld [vmem:[%s2326_s1 + $0x58] sm:$0xff] }
  0x7f   : > { %965 = vperm.xlu0 %1615, %v951_v4   ;;  %1193 = vperm.xlu2 %1617, %v1183_v35  }
  0x80   : > { %1452 = vmatmul.msk.bf16.gmra.mxu0 %vm619_vm0, %v1534_v46 }
  0x81   : > { %1468 = vmatmul.msk.bf16.gmra.mxu1 %vm619_vm0, %v1534_v46  ;;  %v1942_v48 = vpop.permute.xlu2 %431 }
  0x86   : > { %1203 = vperm.xlu1 %1616, %v1185_v12  }
  0x87   : > { %1198 = vperm.xlu0 %1615, %v1184_v11  }
  0x88   : > { %v1950_v51 = vpop.permute.xlu1 %531 }
  0x89   : > { %v1952_v52 = vpop.permute.xlu0 %451  ;;  %v1968_v57 = vpop.permute.xlu2 %516 }
  0x90   : > { %v1970_v58 = vpop.permute.xlu1 %536  ;;  %1453 = vmatmul.msk.bf16.gmra.mxu0 %vm619_vm0, %v1535_v54 }
  0x91   : > { %v1973_v59 = vpop.permute.xlu0 %456  ;;  %1469 = vmatmul.msk.bf16.gmra.mxu1 %vm619_vm0, %v1535_v54  ;;  %v1984_v63 = vpop.permute.xlu2 %501 }
  0x98   : > { %v1982_v62 = vpop.permute.xlu1 %526 }
  0x99   : > { %2336 = vst [vmem:[#allocation5_spill] sm:$0xff] %v1982_v62  ;;  %v1986_v0 = vpop.permute.xlu0 %521  ;;  %v2007_v8 = vpop.permute.xlu2 %416 }
  0x9d   : > { %v1991_v2 = vpop.f32.mrf.mxu0 }
  0x9e   : > { %v1993_v3 = vpop.f32.mrf.mxu1 }
  0xa0   : > { %v2001_v6 = vpop.permute.xlu1 %511  ;;  %1454 = vmatmul.msk.bf16.gmra.mxu0 %vm619_vm0, %v1536_v1 }
  0xa1   : > { %v2004_v7 = vpop.permute.xlu0 %436  ;;  %1470 = vmatmul.msk.bf16.gmra.mxu1 %vm619_vm0, %v1536_v1  ;;  %v402_v17 = vpop.permute.xlu2 %401 }
  0xa5   : > { %v679_v9 = vpop.f32.mrf.mxu0 }
  0xa6   : > { %v768_v10 = vpop.f32.mrf.mxu1 }
  0xa8   : > { %v2015_v13 = vpop.permute.xlu1 %426 }
  0xa9   : > { %v2017_v14 = vpop.permute.xlu0 %421  ;;  %v2036_v25 = vpop.permute.xlu2 %486 }
  0xad   : > { %v682_v18 = vpop.f32.mrf.mxu0 }
  0xae   : > { %v2025_v19 = vpop.f32.mrf.mxu1 }
  0xb0   : > { %v412_v20 = vpop.permute.xlu1 %411  ;;  %1455 = vmatmul.msk.bf16.gmra.mxu0 %vm619_vm0, %v1537_v15 }
  0xb1   : > { %v2028_v21 = vpop.permute.xlu0 %506  ;;  %1471 = vmatmul.msk.bf16.gmra.mxu1 %vm619_vm0, %v1537_v15  ;;  %v2051_v33 = vpop.permute.xlu2 %471 }
  0xb5   : > { %v684_v23 = vpop.f32.mrf.mxu0 }
  0xb6   : > { %v2034_v24 = vpop.f32.mrf.mxu1 }
  0xb8   : > { %v2038_v26 = vpop.permute.xlu1 %496 }
  0xb9   : > { %v2040_v27 = vpop.permute.xlu0 %491  ;;  %v387_v60 = vpop.permute.xlu2 %386 }
  0xba   : > { %v680_v12 = vadd.f32 %v679_v9, %v387_v60 }
  0xbc   : > { %v848_v28 = vmax.f32 %v680_v12, 0.0 }
  0xbd   : > { %v687_v30 = vpop.f32.mrf.mxu0 }
  0xbe   : > { %v776_v31 = vpop.f32.mrf.mxu1  ;;  %v688_v37 = vadd.f32 %v687_v30, %v402_v17 }
  0xbf   : > { %v777_v36 = vadd.f32 %v776_v31, %v402_v17  ;;  %v769_v17 = vadd.f32 %v768_v10, %v387_v60 }
  0xc0   : > { %v2048_v32 = vpop.permute.xlu1 %481  ;;  %1456 = vmatmul.msk.bf16.gmra.mxu0 %vm619_vm0, %v1538_v29  ;;  %v854_v46 = vmax.f32 %v688_v37, 0.0 }
  0xc1   : > { %v407_v34 = vpop.permute.xlu0 %406  ;;  %1472 = vmatmul.msk.bf16.gmra.mxu1 %vm619_vm0, %v1538_v29  ;;  %v855_v42 = vmax.f32 %v777_v36, 0.0  ;;  %v849_v29 = vmax.f32 %v769_v17, 0.0 }
  0xc5   : > { %v689_v38 = vpop.f32.mrf.mxu0 }
  0xc6   : > { %v690_v39 = vadd.f32 %v689_v38, %v407_v34  ;;  %v778_v40 = vpop.f32.mrf.mxu1 }
  0xc7   : > { %v779_v44 = vadd.f32 %v778_v40, %v407_v34 }
  0xc8   : > { %v856_v47 = vmax.f32 %v690_v39, 0.0  ;;  %v397_v49 = vpop.permute.xlu1 %396 }
  0xc9   : > { %v857_v50 = vmax.f32 %v779_v44, 0.0  ;;  %v685_v53 = vadd.f32 %v684_v23, %v397_v49  ;;  %v392_v54 = vpop.permute.xlu0 %391 }
  0xca   : > { %v683_v55 = vadd.f32 %v682_v18, %v392_v54  ;;  %v2057_v56 = vpack.c.bf16 %v856_v47, %v854_v46 }
  0xcb   : > { %v2059_v61 = vpack.c.bf16 %v857_v50, %v855_v42  ;;  %v852_v1 = vmax.f32 %v685_v53, 0.0  ;;  %v774_v53 = vadd.f32 %v2034_v24, %v397_v49 }
  0xcc   : > { %v850_v4 = vmax.f32 %v683_v55, 0.0 }
  0xcd   : > { %v692_v11 = vpop.f32.mrf.mxu0  ;;  %v853_v55 = vmax.f32 %v774_v53, 0.0 }
  0xce   : > { %v781_v15 = vpop.f32.mrf.mxu1  ;;  %v2064_v16 = vpack.c.bf16 %v852_v1, %v850_v4  ;;  %v693_v35 = vadd.f32 %v692_v11, %v412_v20 }
  0xcf   : > { %v782_v30 = vadd.f32 %v781_v15, %v412_v20  ;;  %v1540_v20 = vld [vmem:[%s2326_s1 + $0x60] sm:$0xff]  ;;  %v747_v15 = vpop.f32.mrf.mxu2 }
  0xd0   : > { %v382_v22 = vpop.permute.xlu1 %381  ;;  %1457 = vmatmul.msk.bf16.gmra.mxu0 %vm619_vm0, %v1539_v5 }
  0xd1   : > { %v678_v18 = vadd.f32 %v1991_v2, %v382_v22  ;;  %v767_v23 = vadd.f32 %v1993_v3, %v382_v22  ;;  %1473 = vmatmul.msk.bf16.gmra.mxu1 %vm619_vm0, %v1539_v5  ;;  %v859_v38 = vmax.f32 %v782_v30, 0.0  ;;  %v858_v3 = vmax.f32 %v693_v35, 0.0 }
  0xd3   : > { %v846_v31 = vmax.f32 %v678_v18, 0.0  ;;  %v847_v34 = vmax.f32 %v767_v23, 0.0 }
  0xd5   : > { %v694_v9 = vpop.f32.mrf.mxu0  ;;  %v2070_v36 = vpack.c.bf16 %v848_v28, %v846_v31  ;;  %v2074_v2 = vpack.c.bf16 %v849_v29, %v847_v34 }
  0xd6   : > { %v695_v10 = vadd.f32 %v694_v9, %v2007_v8  ;;  %v783_v37 = vpop.f32.mrf.mxu1 }
  0xd7   : > { %v784_v39 = vadd.f32 %v783_v37, %v2007_v8  ;;  %v772_v8 = vadd.f32 %v2025_v19, %v392_v54  ;;  %v749_v18 = vpop.f32.mrf.mxu2  ;;  %v748_v37 = vadd.f32 %v747_v15, %v1986_v0 }
  0xd8   : > { %v860_v40 = vmax.f32 %v695_v10, 0.0 }
  0xd9   : > { %v861_v42 = vmax.f32 %v784_v39, 0.0  ;;  %v851_v60 = vmax.f32 %v772_v8, 0.0 }
  0xda   : > { %v2076_v44 = vpack.c.bf16 %v860_v40, %v858_v3 }
  0xdb   : > { %v2078_v46 = vpack.c.bf16 %v861_v42, %v859_v38  ;;  %v2091_v5 = vpack.c.bf16 %v853_v55, %v851_v60  ;;  %v750_v38 = vadd.f32 %v749_v18, %v1982_v62 }
  0xdd   : > { %v697_v47 = vpop.f32.mrf.mxu0 }
  0xde   : > { %v2083_v50 = vpop.f32.mrf.mxu1 }
  0xdf   : > { %v752_v29 = vpop.f32.mrf.mxu2 }
  0xe0   : > { %1458 = vmatmul.msk.bf16.gmra.mxu0 %vm619_vm0, %v1540_v20  ;;  %v753_v30 = vadd.f32 %v752_v29, %v1950_v51  ;;  %v904_v29 = vmax.f32 %v750_v38, 0.0 }
  0xe1   : > { %1474 = vmatmul.msk.bf16.gmra.mxu1 %vm619_vm0, %v1540_v20  ;;  %v2111_v20 = vpop.permute.xlu0 %476 }
  0xe2   : > { %v906_v39 = vmax.f32 %v753_v30, 0.0 }
  0xe5   : > { %v699_v1 = vpop.f32.mrf.mxu0 }
  0xe6   : > { %v2089_v4 = vpop.f32.mrf.mxu1 }
  0xe7   : > { %v754_v10 = vpop.f32.mrf.mxu2 }
  0xe8   : > { %v755_v3 = vadd.f32 %v754_v10, %v1970_v58 }
  0xea   : > { %v908_v8 = vmax.f32 %v755_v3, 0.0  ;;  %v698_v3 = vadd.f32 %v697_v47, %v2017_v14 }
  0xed   : > { %v702_v11 = vpop.f32.mrf.mxu0 }
  0xee   : > { %v2093_v12 = vpop.f32.mrf.mxu1  ;;  %v703_v15 = vadd.f32 %v702_v11, %v1942_v48  ;;  %v862_v11 = vmax.f32 %v698_v3, 0.0 }
  0xef   : > { %v792_v3 = vadd.f32 %v2093_v12, %v1942_v48 }
  0xf0   : > { %1459 = vmatmul.msk.bf16.gmra.mxu0 %vm619_vm0, %v1916_v41 }
  0xf5   : > { %v704_v24 = vpop.f32.mrf.mxu0 }
  0xf6   : > { %v2097_v49 = vpop.f32.mrf.mxu1  ;;  %v705_v55 = vadd.f32 %v704_v24, %v2004_v7  ;;  %v866_v24 = vmax.f32 %v703_v15, 0.0 }
  0xfd   : > { %v707_v19 = vpop.f32.mrf.mxu0 }
  0xfe   : > { %v2099_v54 = vpop.f32.mrf.mxu1  ;;  %v708_v40 = vadd.f32 %v707_v19, %v1924_v43  ;;  %v700_v19 = vadd.f32 %v699_v1, %v2015_v13 }
 0x100   : > { %v870_v18 = vmax.f32 %v708_v40, 0.0 }
 0x105   : > { %v709_v17 = vpop.f32.mrf.mxu0 }
 0x106   : > { %v2101_v22 = vpop.f32.mrf.mxu1  ;;  %v710_v41 = vadd.f32 %v709_v17, %v1930_v45 }
 0x108   : > { %v872_v60 = vmax.f32 %v710_v41, 0.0  ;;  %v864_v41 = vmax.f32 %v700_v19, 0.0  ;;  %v797_v19 = vadd.f32 %v2099_v54, %v1924_v43  ;;  %v1545_v43 = vld [vmem:[%s2328_s3 + $0x4] sm:$0xf0] }
 0x10a   : > { %v930_v62 = vpack.c.bf16 %v872_v60, %v870_v18 }
 0x10d   : > { %v712_v23 = vpop.f32.mrf.mxu0 }
 0x10e   : > { %v801_v28 = vpop.f32.mrf.mxu1  ;;  %v713_v31 = vadd.f32 %v712_v23, %v1952_v52  ;;  %v902_v23 = vmax.f32 %v748_v37, 0.0  ;;  %v462_v37 = vpop.permute.xlu0 %461 }
 0x10f   : > { %v802_v15 = vadd.f32 %v801_v28, %v1952_v52  ;;  %v1480_v52 = vld [vmem:[%s2328_s3] sm:$0xf] }
 0x110   : > { %v874_v42 = vmax.f32 %v713_v31, 0.0  ;;  %v868_v31 = vmax.f32 %v705_v55, 0.0  ;;  %v926_v55 = vpack.c.bf16 %v864_v41, %v862_v11  ;;  %v1481_v12 = vor.u32 %v1545_v43, %v1480_v52 }
 0x112   : > { %v928_v38 = vpack.c.bf16 %v868_v31, %v866_v24  ;;  %v799_v31 = vadd.f32 %v2101_v22, %v1930_v45  ;;  %v794_v45 = vadd.f32 %v2097_v49, %v2004_v7  ;;  %v787_v7 = vadd.f32 %v2083_v50, %v2017_v14 }
 0x113   : > { %v789_v49 = vadd.f32 %v2089_v4, %v2015_v13 }
 0x114   : > { %v869_v24 = vmax.f32 %v794_v45, 0.0  ;;  %v863_v11 = vmax.f32 %v787_v7, 0.0 }
 0x115   : > { %v714_v34 = vpop.f32.mrf.mxu0 }
 0x116   : > { %v715_v35 = vadd.f32 %v714_v34, %v1973_v59  ;;  %v803_v9 = vpop.f32.mrf.mxu1  ;;  %v948_v34 = vpack.c.bf16 %v908_v8, %v906_v39 }
 0x117   : > { %v804_v18 = vadd.f32 %v803_v9, %v1973_v59  ;;  %v871_v59 = vmax.f32 %v797_v19, 0.0  ;;  %v867_v9 = vmax.f32 %v792_v3, 0.0 }
 0x118   : > { %v876_v53 = vmax.f32 %v715_v35, 0.0  ;;  %1067 = vmatpush.bf16.msrb.mxu3 %v948_v34  ;;  %v946_v35 = vpack.c.bf16 %v904_v29, %v902_v23 }
 0x11a   : > { %v932_v17 = vpack.c.bf16 %v876_v53, %v874_v42  ;;  %v467_v42 = vpop.permute.xlu1 %466 }
 0x11c   : > { %1038 = vmatpush.bf16.msrb.mxu2 %v932_v17  ;;  %1068 = vmatpush.bf16.msrb.mxu3 %v946_v35  ;;  %v877_v35 = vmax.f32 %v804_v18, 0.0 }
 0x11d   : > { %v717_v30 = vpop.f32.mrf.mxu0 }
 0x11e   : > { %v806_v10 = vpop.f32.mrf.mxu1  ;;  %v718_v40 = vadd.f32 %v717_v30, %v462_v37 }
 0x11f   : > { %v807_v39 = vadd.f32 %v806_v10, %v462_v37  ;;  %v875_v10 = vmax.f32 %v802_v15, 0.0 }
 0x120   : > { %1039 = vmatpush.bf16.msrb.mxu2 %v930_v62  ;;  %v878_v23 = vmax.f32 %v718_v40, 0.0  ;;  %v865_v40 = vmax.f32 %v789_v49, 0.0 }
 0x121   : > { %v879_v17 = vmax.f32 %v807_v39, 0.0  ;;  %v933_v54 = vpack.c.bf16 %v877_v35, %v875_v10 }
 0x124   : > { %1040 = vmatpush.bf16.msrb.mxu2 %v928_v38  ;;  %v929_v38 = vpack.c.bf16 %v869_v24, %v867_v9 }
 0x125   : > { %v719_v53 = vpop.f32.mrf.mxu0 }
 0x126   : > { %v720_v8 = vadd.f32 %v719_v53, %v467_v42  ;;  %v808_v1 = vpop.f32.mrf.mxu1  ;;  %v1547_v53 = vld [vmem:[%s2328_s3 + $0x14] sm:$0xf0] }
 0x127   : > { %v809_v60 = vadd.f32 %v808_v1, %v467_v42  ;;  %v1488_v42 = vld [vmem:[%s2328_s3 + $0x10] sm:$0xf] }
 0x128   : > { %v880_v29 = vmax.f32 %v720_v8, 0.0  ;;  %1041 = vmatpush.bf16.msrb.mxu2 %v926_v55  ;;  %v2155_v50 = vor.u32 %v1547_v53, %v1488_v42  ;;  %v831_v8 = vpop.f32.mrf.mxu3  ;;  %v1496_v55 = vld [vmem:[%s2328_s3 + $0x20] sm:$0xf] }
 0x129   : > { %v881_v47 = vmax.f32 %v809_v60, 0.0 }
 0x12a   : > { %v2117_v62 = vpack.c.bf16 %v880_v29, %v878_v23  ;;  %v1504_v29 = vld [vmem:[%s2328_s3 + $0x30] sm:$0xf] }
 0x12b   : > { %v2119_v34 = vpack.c.bf16 %v881_v47, %v879_v17  ;;  %v1551_v47 = vld [vmem:[%s2328_s3 + $0x34] sm:$0xf0] }
 0x12c   : > { %1042 = vmatpush.bf16.msrb.mxu2 %v2076_v44 }
 0x12d   : > { %v722_v30 = vpop.f32.mrf.mxu0 }
 0x12e   : > { %v723_v44 = vadd.f32 %v722_v30, %v2051_v33  ;;  %v2158_v13 = vpop.f32.mrf.mxu1  ;;  %v2183_v30 = vor.u32 %v1551_v47, %v1504_v29  ;;  %v1544_v29 = vld [vmem:[%s2328_s3 + $0x4] sm:$0xf] }
 0x130   : > { %1043 = vmatpush.bf16.msrb.mxu2 %v2057_v56  ;;  %v873_v56 = vmax.f32 %v799_v31, 0.0  ;;  %v882_v28 = vmax.f32 %v723_v44, 0.0 }
 0x132   : > { %v931_v41 = vpack.c.bf16 %v873_v56, %v871_v59 }
 0x134   : > { %1044 = vmatpush.bf16.msrb.mxu2 %v2064_v16 }
 0x135   : > { %v724_v22 = vpop.f32.mrf.mxu0 }
 0x136   : > { %v725_v48 = vadd.f32 %v724_v22, %v2111_v20  ;;  %v2163_v1 = vpop.f32.mrf.mxu1 }
 0x138   : > { %v884_v16 = vmax.f32 %v725_v48, 0.0  ;;  %1045 = vmatpush.bf16.msrb.mxu2 %v2070_v36  ;;  %v927_v36 = vpack.c.bf16 %v865_v40, %v863_v11 }
 0x13a   : > { %v2143_v37 = vpack.c.bf16 %v884_v16, %v882_v28 }
 0x13b   : > { %1046 = vmatmul.bf16.vlgmr.msrb.gmra.mxu2 %v1481_v12 }
 0x13c   : > { %1096 = vmatpush.bf16.msra.mxu2 %v933_v54 }
 0x13d   : > { %v727_v39 = vpop.f32.mrf.mxu0 }
 0x13e   : > { %v2175_v23 = vpop.f32.mrf.mxu1  ;;  %v728_v49 = vadd.f32 %v727_v39, %v2048_v32 }
 0x140   : > { %1097 = vmatpush.bf16.msra.mxu2 %v931_v41  ;;  %v886_v42 = vmax.f32 %v728_v49, 0.0 }
 0x144   : > { %1098 = vmatpush.bf16.msra.mxu2 %v929_v38 }
 0x145   : > { %v729_v14 = vpop.f32.mrf.mxu0 }
 0x146   : > { %v730_v24 = vadd.f32 %v729_v14, %v2036_v25 }
 0x148   : > { %1099 = vmatpush.bf16.msra.mxu2 %v927_v36  ;;  %v888_v11 = vmax.f32 %v730_v24, 0.0 }
 0x14b   : > { %1051 = vmatmul.bf16.gmra.mxu2 %v2155_v50 }
 0x14c   : > { %1100 = vmatpush.bf16.msra.mxu2 %v2078_v46  ;;  %v1549_v46 = vld [vmem:[%s2328_s3 + $0x24] sm:$0xf0] }
 0x14d   : > { %v732_v4 = vpop.f32.mrf.mxu0  ;;  %v2172_v60 = vor.u32 %v1549_v46, %v1496_v55  ;;  %v2337_v46 = vld [vmem:[#allocation5_spill] sm:$0xff] }
 0x14e   : > { %v733_v28 = vadd.f32 %v732_v4, %v2040_v27 }
 0x150   : > { %1101 = vmatpush.bf16.msra.mxu2 %v2059_v61  ;;  %v833_v61 = vpop.f32.mrf.mxu3  ;;  %v890_v38 = vmax.f32 %v733_v28, 0.0 }
 0x154   : > { %1102 = vmatpush.bf16.msra.mxu2 %v2091_v5 }
 0x155   : > { %v734_v17 = vpop.f32.mrf.mxu0 }
 0x156   : > { %v735_v54 = vadd.f32 %v734_v17, %v2038_v26 }
 0x158   : > { %1103 = vmatpush.bf16.msra.mxu2 %v2074_v2  ;;  %v836_v18 = vpop.f32.mrf.mxu3  ;;  %v2185_v2 = vpop.f32.mrf.mxu1  ;;  %v892_v41 = vmax.f32 %v735_v54, 0.0 }
 0x159   : > { %v837_v14 = vadd.f32 %v836_v18, %v1986_v0  ;;  %v834_v0 = vadd.f32 %v833_v61, %v1968_v57 }
 0x15a   : > { %v940_v40 = vpack.c.bf16 %v892_v41, %v890_v38 }
 0x15b   : > { %1056 = vmatmul.bf16.gmra.mxu2 %v2172_v60  ;;  %v903_v47 = vmax.f32 %v837_v14, 0.0 }
 0x15d   : > { %v737_v5 = vpop.f32.mrf.mxu0 }
 0x15e   : > { %v738_v43 = vadd.f32 %v737_v5, %v1984_v63 }
 0x160   : > { %v838_v31 = vpop.f32.mrf.mxu3  ;;  %v821_v10 = vpop.f32.mrf.mxu1  ;;  %v894_v9 = vmax.f32 %v738_v43, 0.0 }
 0x161   : > { %v839_v17 = vadd.f32 %v838_v31, %v2337_v46  ;;  %v822_v61 = vadd.f32 %v821_v10, %v2040_v27 }
 0x163   : > { %v891_v27 = vmax.f32 %v822_v61, 0.0 }
 0x165   : > { %v739_v15 = vpop.f32.mrf.mxu0 }
 0x166   : > { %v740_v44 = vadd.f32 %v739_v15, %v2028_v21  ;;  %v905_v15 = vmax.f32 %v839_v17, 0.0  ;;  %v2248_v17 = vpop.permute.xlu0 %995 }
 0x168   : > { %v841_v56 = vpop.f32.mrf.mxu3  ;;  %v896_v22 = vmax.f32 %v740_v44, 0.0  ;;  %v823_v16 = vpop.f32.mrf.mxu1 }
 0x169   : > { %v842_v4 = vadd.f32 %v841_v56, %v1950_v51  ;;  %v1482_v51 = vld [vmem:[%s2328_s3 + $0x8] sm:$0xf0] }
 0x16a   : > { %v942_v7 = vpack.c.bf16 %v896_v22, %v894_v9  ;;  %v2244_v9 = vpop.permute.xlu2 %990 }
 0x16b   : > { %1061 = vmatmul.bf16.gmra.mxu2 %v2183_v30  ;;  %v907_v5 = vmax.f32 %v842_v4, 0.0 }
 0x16d   : > { %v742_v19 = vpop.f32.mrf.mxu0 }
 0x16e   : > { %v743_v35 = vadd.f32 %v742_v19, %v2001_v6  ;;  %v1485_v19 = vor.u32 %v1544_v29, %v1482_v51  ;;  %v2250_v51 = vpop.permute.xlu0 %970 }
 0x170   : > { %v898_v45 = vmax.f32 %v743_v35, 0.0  ;;  %v843_v36 = vpop.f32.mrf.mxu3  ;;  %v826_v53 = vpop.f32.mrf.mxu1  ;;  %v947_v35 = vpack.c.bf16 %v905_v15, %v903_v47 }
 0x171   : > { %v844_v55 = vadd.f32 %v843_v36, %v1970_v58  ;;  %v832_v58 = vadd.f32 %v831_v8, %v2001_v6  ;;  %v827_v44 = vadd.f32 %v826_v53, %v1984_v63  ;;  %v824_v6 = vadd.f32 %v823_v16, %v2038_v26  ;;  %v1546_v63 = vld [vmem:[%s2328_s3 + $0x14] sm:$0xf] }
 0x172   : > { %v817_v26 = vadd.f32 %v2175_v23, %v2048_v32  ;;  %v1548_v32 = vld [vmem:[%s2328_s3 + $0x24] sm:$0xf]  ;;  %v2246_v24 = vpop.permute.xlu2 %985 }
 0x173   : > { %v909_v39 = vmax.f32 %v844_v55, 0.0  ;;  %v893_v43 = vmax.f32 %v824_v6, 0.0 }
 0x174   : > { %v887_v56 = vmax.f32 %v817_v26, 0.0 }
 0x175   : > { %v744_v3 = vpop.f32.mrf.mxu0  ;;  %v949_v18 = vpack.c.bf16 %v909_v39, %v907_v5  ;;  %v941_v10 = vpack.c.bf16 %v893_v43, %v891_v27  ;;  %v981_v39 = vpop.permute.xlu1 %980 }
 0x176   : > { %v745_v52 = vadd.f32 %v744_v3, %v1968_v57  ;;  %v966_v43 = vpop.permute.xlu0 %965 }
 0x178   : > { %v900_v59 = vmax.f32 %v745_v52, 0.0  ;;  %v828_v31 = vpop.f32.mrf.mxu1  ;;  %v895_v52 = vmax.f32 %v827_v44, 0.0 }
 0x179   : > { %v829_v3 = vadd.f32 %v828_v31, %v2028_v21  ;;  %v1490_v21 = vld [vmem:[%s2328_s3 + $0x18] sm:$0xf0] }
 0x17a   : > { %v944_v48 = vpack.c.bf16 %v900_v59, %v898_v45  ;;  %v1493_v59 = vor.u32 %v1546_v63, %v1490_v21 }
 0x17b   : > { %1104 = vmatmul.bf16.vlgmr.msra.gmra.mxu2 %v1481_v12  ;;  %v938_v12 = vpack.c.bf16 %v888_v11, %v886_v42  ;;  %v897_v57 = vmax.f32 %v829_v3, 0.0 }
 0x17c   : > { %1069 = vmatpush.bf16.msrb.mxu3 %v944_v48 }
 0x17d   : > { %v943_v45 = vpack.c.bf16 %v897_v57, %v895_v52 }
 0x180   : > { %1070 = vmatpush.bf16.msrb.mxu3 %v942_v7  ;;  %v961_v7 = vpop.permute.xlu2 %960 }
 0x184   : > { %1071 = vmatpush.bf16.msrb.mxu3 %v940_v40 }
 0x188   : > { %1072 = vmatpush.bf16.msrb.mxu3 %v938_v12 }
 0x18b   : > { %1109 = vmatmul.bf16.gmra.mxu2 %v2155_v50  ;;  %v901_v50 = vmax.f32 %v834_v0, 0.0 }
 0x18c   : > { %1073 = vmatpush.bf16.msrb.mxu3 %v2143_v37  ;;  %v899_v37 = vmax.f32 %v832_v58, 0.0 }
 0x18e   : > { %v945_v8 = vpack.c.bf16 %v901_v50, %v899_v37 }
 0x190   : > { %1074 = vmatpush.bf16.msrb.mxu3 %v2117_v62  ;;  %v819_v62 = vadd.f32 %v2185_v2, %v2036_v25  ;;  %v812_v25 = vadd.f32 %v2158_v13, %v2051_v33  ;;  %v814_v2 = vadd.f32 %v2163_v1, %v2111_v20  ;;  %v1498_v33 = vld [vmem:[%s2328_s3 + $0x28] sm:$0xf0]  ;;  %v1550_v13 = vld [vmem:[%s2328_s3 + $0x34] sm:$0xf]  ;;  %v1506_v1 = vld [vmem:[%s2328_s3 + $0x38] sm:$0xf0] }
 0x191   : > { %v1501_v20 = vor.u32 %v1548_v32, %v1498_v33  ;;  %v1509_v23 = vor.u32 %v1550_v13, %v1506_v1  ;;  %v1552_v33 = vld [vmem:[%s2330_s5] sm:$0xff] }
 0x192   : > { %v883_v54 = vmax.f32 %v812_v25, 0.0  ;;  %v885_v22 = vmax.f32 %v814_v2, 0.0 }
 0x193   : > { %1075 = vmatmul.bf16.vlgmr.msrb.gmra.mxu3 %v1485_v19 }
 0x194   : > { %1125 = vmatpush.bf16.msra.mxu3 %v949_v18  ;;  %v937_v28 = vpack.c.bf16 %v885_v22, %v883_v54 }
 0x198   : > { %1126 = vmatpush.bf16.msra.mxu3 %v947_v35  ;;  %v976_v35 = vpop.permute.xlu1 %975 }
 0x19b   : > { %1114 = vmatmul.bf16.gmra.mxu2 %v2172_v60  ;;  %v889_v60 = vmax.f32 %v819_v62, 0.0 }
 0x19c   : > { %1127 = vmatpush.bf16.msra.mxu3 %v945_v8 }
 0x19d   : > { %v939_v48 = vpack.c.bf16 %v889_v60, %v887_v56 }
 0x1a0   : > { %1128 = vmatpush.bf16.msra.mxu3 %v943_v45 }
 0x1a3   : > { %1080 = vmatmul.bf16.gmra.mxu3 %v1493_v59 }
 0x1a4   : > { %1129 = vmatpush.bf16.msra.mxu3 %v941_v10 }
 0x1a8   : > { %1130 = vmatpush.bf16.msra.mxu3 %v939_v48 }
 0x1ab   : > { %1119 = vmatmul.bf16.gmra.mxu2 %v2183_v30 }
 0x1ac   : > { %1131 = vmatpush.bf16.msra.mxu3 %v937_v28 }
 0x1b0   : > { %1132 = vmatpush.bf16.msra.mxu3 %v2119_v34 }
 0x1b3   : > { %1085 = vmatmul.bf16.gmra.mxu3 %v1501_v20 }
 0x1be   : > { %v1047_v30 = vpop.f32.mrf.mxu2 }
 0x1bf   : > { %v1048_v49 = vadd.f32 %v1047_v30, %v961_v7  ;;  %v1553_v30 = vld [vmem:[%s2330_s5 + $0x8] sm:$0xff] }
 0x1c3   : > { %1090 = vmatmul.bf16.gmra.mxu3 %v1509_v23 }
 0x1c6   : > { %v1049_v16 = vpop.f32.mrf.mxu2 }
 0x1c7   : > { %v1050_v45 = vadd.f32 %v1049_v16, %v966_v43 }
 0x1ce   : > { %v1052_v34 = vpop.f32.mrf.mxu2 }
 0x1cf   : > { %v1053_v8 = vadd.f32 %v1052_v34, %v2250_v51 }
 0x1d3   : > { %1133 = vmatmul.bf16.vlgmr.msra.gmra.mxu3 %v1485_v19 }
 0x1d6   : > { %v1054_v41 = vpop.f32.mrf.mxu2 }
 0x1d7   : > { %v1055_v3 = vadd.f32 %v1054_v41, %v976_v35 }
 0x1de   : > { %v1057_v40 = vpop.f32.mrf.mxu2 }
 0x1df   : > { %v1058_v31 = vadd.f32 %v1057_v40, %v981_v39 }
 0x1e3   : > { %1138 = vmatmul.bf16.gmra.mxu3 %v1493_v59 }
 0x1e6   : > { %v1059_v42 = vpop.f32.mrf.mxu2 }
 0x1e7   : > { %v1060_v0 = vadd.f32 %v1059_v42, %v2246_v24 }
 0x1ee   : > { %v1062_v4 = vpop.f32.mrf.mxu2 }
 0x1ef   : > { %v1063_v58 = vadd.f32 %v1062_v4, %v2244_v9 }
 0x1f3   : > { %1143 = vmatmul.bf16.gmra.mxu3 %v1501_v20 }
 0x1f6   : > { %v1064_v14 = vpop.f32.mrf.mxu2 }
 0x1f7   : > { %v1065_v47 = vadd.f32 %v1064_v14, %v2248_v17 }
 0x1fe   : > { %v1105_v5 = vpop.f32.mrf.mxu2 }
 0x1ff   : > { %v1106_v63 = vadd.f32 %v1105_v5, %v961_v7 }
 0x203   : > { %1148 = vmatmul.bf16.gmra.mxu3 %v1509_v23 }
 0x206   : > { %v2255_v18 = vpop.f32.mrf.mxu2 }
 0x20e   : > { %v1110_v59 = vpop.f32.mrf.mxu2 }
 0x216   : > { %v1076_v38 = vpop.f32.mrf.mxu3  ;;  %v1112_v20 = vpop.f32.mrf.mxu2 }
 0x217   : > { %v1077_v11 = vadd.f32 %v1076_v38, %v1048_v49 }
 0x219   : > { %v1154_v48 = vmax.f32 %v1077_v11, 0.0 }
 0x21e   : > { %v1078_v36 = vpop.f32.mrf.mxu3  ;;  %v1115_v1 = vpop.f32.mrf.mxu2 }
 0x21f   : > { %v1079_v25 = vadd.f32 %v1078_v36, %v1050_v45  ;;  %v1116_v41 = vadd.f32 %v1115_v1, %v981_v39 }
 0x221   : > { %v1156_v54 = vmax.f32 %v1079_v25, 0.0 }
 0x223   : > { %v1174_v32 = vpack.c.bf16 %v1156_v54, %v1154_v48 }
 0x226   : > { %v1081_v53 = vpop.f32.mrf.mxu3  ;;  %v1117_v16 = vpop.f32.mrf.mxu2 }
 0x227   : > { %v1082_v21 = vadd.f32 %v1081_v53, %v1053_v8  ;;  %v1118_v7 = vadd.f32 %v1117_v16, %v2246_v24  ;;  %v1111_v24 = vadd.f32 %v1110_v59, %v2250_v51  ;;  %v1189_v51 = vpop.permute.xlu1 %1188  ;;  %v1194_v8 = vpop.permute.xlu2 %1193 }
 0x229   : > { %v1158_v56 = vmax.f32 %v1082_v21, 0.0 }
 0x22e   : > { %v1083_v12 = vpop.f32.mrf.mxu3  ;;  %v1120_v40 = vpop.f32.mrf.mxu2 }
 0x22f   : > { %v1084_v61 = vadd.f32 %v1083_v12, %v1055_v3 }
 0x231   : > { %v1160_v2 = vmax.f32 %v1084_v61, 0.0 }
 0x233   : > { %v1176_v22 = vpack.c.bf16 %v1160_v2, %v1158_v56 }
 0x236   : > { %v1086_v55 = vpop.f32.mrf.mxu3  ;;  %v1122_v4 = vpop.f32.mrf.mxu2 }
 0x237   : > { %v1087_v44 = vadd.f32 %v1086_v55, %v1058_v31  ;;  %v1121_v55 = vadd.f32 %v1120_v40, %v2244_v9  ;;  %v1123_v14 = vadd.f32 %v1122_v4, %v2248_v17 }
 0x239   : > { %v1162_v26 = vmax.f32 %v1087_v44, 0.0 }
 0x23e   : > { %v1088_v46 = vpop.f32.mrf.mxu3 }
 0x23f   : > { %v1089_v37 = vadd.f32 %v1088_v46, %v1060_v0 }
 0x241   : > { %v1164_v52 = vmax.f32 %v1089_v37, 0.0 }
 0x243   : > { %v1178_v60 = vpack.c.bf16 %v1164_v52, %v1162_v26  ;;  %v1204_v26 = vpop.permute.xlu1 %1203 }
 0x246   : > { %v1091_v29 = vpop.f32.mrf.mxu3 }
 0x247   : > { %v1092_v15 = vadd.f32 %v1091_v29, %v1063_v58  ;;  %v1113_v58 = vadd.f32 %v1112_v20, %v976_v35 }
 0x249   : > { %v1166_v6 = vmax.f32 %v1092_v15, 0.0 }
 0x24e   : > { %v1093_v19 = vpop.f32.mrf.mxu3 }
 0x24f   : > { %v1094_v50 = vadd.f32 %v1093_v19, %v1065_v47  ;;  %v1108_v19 = vadd.f32 %v2255_v18, %v966_v43  ;;  %v1199_v43 = vpop.permute.xlu0 %1198 }
 0x251   : > { %v1168_v57 = vmax.f32 %v1094_v50, 0.0 }
 0x253   : > { %v1180_v62 = vpack.c.bf16 %v1168_v57, %v1166_v6 }
 0x255   : > { %1227 = vmatpush.bf16.msrb.mxu2 %v1180_v62 }
 0x256   : > { %v1134_v27 = vpop.f32.mrf.mxu3 }
 0x257   : > { %v1135_v10 = vadd.f32 %v1134_v27, %v1106_v63 }
 0x259   : > { %1228 = vmatpush.bf16.msrb.mxu2 %v1178_v60  ;;  %v1155_v44 = vmax.f32 %v1135_v10, 0.0 }
 0x25d   : > { %1229 = vmatpush.bf16.msrb.mxu2 %v1176_v22 }
 0x25e   : > { %v1136_v28 = vpop.f32.mrf.mxu3 }
 0x25f   : > { %v1137_v37 = vadd.f32 %v1136_v28, %v1108_v19 }
 0x261   : > { %1230 = vmatpush.bf16.msrb.mxu2 %v1174_v32  ;;  %v1157_v17 = vmax.f32 %v1137_v37, 0.0 }
 0x263   : > { %v1175_v35 = vpack.c.bf16 %v1157_v17, %v1155_v44 }
 0x264   : > { %1518 = vmatmul.msk.bf16.vlgmr.msrb.gmra.mxu2 %vm1216_vm1, %v1552_v33 }
 0x266   : > { %v1139_v13 = vpop.f32.mrf.mxu3 }
 0x267   : > { %v1140_v31 = vadd.f32 %v1139_v13, %v1111_v24 }
 0x269   : > { %v1159_v50 = vmax.f32 %v1140_v31, 0.0 }
 0x26e   : > { %v1141_v23 = vpop.f32.mrf.mxu3 }
 0x26f   : > { %v1142_v47 = vadd.f32 %v1141_v23, %v1113_v58 }
 0x271   : > { %v1161_v9 = vmax.f32 %v1142_v47, 0.0 }
 0x273   : > { %v1177_v3 = vpack.c.bf16 %v1161_v9, %v1159_v50 }
 0x274   : > { %1519 = vmatmul.msk.bf16.gmra.mxu2 %vm1216_vm1, %v1553_v30 }
 0x276   : > { %v1144_v34 = vpop.f32.mrf.mxu3 }
 0x277   : > { %v1145_v49 = vadd.f32 %v1144_v34, %v1116_v41 }
 0x279   : > { %v1163_v36 = vmax.f32 %v1145_v49, 0.0 }
 0x27e   : > { %v1146_v38 = vpop.f32.mrf.mxu3 }
 0x27f   : > { %v1147_v11 = vadd.f32 %v1146_v38, %v1118_v7 }
 0x281   : > { %v1165_v42 = vmax.f32 %v1147_v11, 0.0 }
 0x283   : > { %v1179_v53 = vpack.c.bf16 %v1165_v42, %v1163_v36 }
 0x286   : > { %v1149_v12 = vpop.f32.mrf.mxu3 }
 0x287   : > { %v1150_v46 = vadd.f32 %v1149_v12, %v1121_v55 }
 0x289   : > { %v1167_v39 = vmax.f32 %v1150_v46, 0.0 }
 0x28e   : > { %v1151_v5 = vpop.f32.mrf.mxu3 }
 0x28f   : > { %v1152_v29 = vadd.f32 %v1151_v5, %v1123_v14 }
 0x291   : > { %v1169_v0 = vmax.f32 %v1152_v29, 0.0 }
 0x293   : > { %v1181_v15 = vpack.c.bf16 %v1169_v0, %v1167_v39 }
 0x295   : > { %1246 = vmatpush.bf16.msrb.mxu3 %v1181_v15 }
 0x299   : > { %1247 = vmatpush.bf16.msrb.mxu3 %v1179_v53 }
 0x29d   : > { %1248 = vmatpush.bf16.msrb.mxu3 %v1177_v3 }
 0x2a1   : > { %1249 = vmatpush.bf16.msrb.mxu3 %v1175_v35 }
 0x2a4   : > { %1520 = vmatmul.msk.bf16.vlgmr.msrb.gmra.mxu3 %vm1216_vm1, %v1552_v33 }
 0x2b4   : > { %1521 = vmatmul.msk.bf16.gmra.mxu3 %vm1216_vm1, %v1553_v30 }
 0x2e7   : > { %v1232_v18 = vpop.f32.mrf.mxu2 }
 0x2e8   : > { %v1233_v6 = vadd.f32 %v1232_v18, %v1189_v51 }
 0x2ea   : > { %v1261_v57 = vmax.f32 %v1233_v6, 0.0 }
 0x2ec   : > { %1269 = vst [vmem:[%s2276_s22] sm:$0xff] %v1261_v57 }
 0x2ef   : > { %v1234_v61 = vpop.f32.mrf.mxu2 }
 0x2f0   : > { %v1235_v52 = vadd.f32 %v1234_v61, %v1194_v8 }
 0x2f2   : > { %v1263_v62 = vmax.f32 %v1235_v52, 0.0 }
 0x2f4   : > { %1271 = vst [vmem:[%s2276_s22 + $0x10] sm:$0xff] %v1263_v62 }
 0x2f7   : > { %v1237_v45 = vpop.f32.mrf.mxu2 }
 0x2f8   : > { %v1238_v63 = vadd.f32 %v1237_v45, %v1199_v43 }
 0x2fa   : > { %v1265_v21 = vmax.f32 %v1238_v63, 0.0 }
 0x2fc   : > { %1273 = vst [vmem:[%s2276_s22 + $0x20] sm:$0xff] %v1265_v21 }
 0x2ff   : > { %v1239_v27 = vpop.f32.mrf.mxu2 }
 0x300   : > { %v1240_v25 = vadd.f32 %v1239_v27, %v1204_v26 }
 0x302   : > { %v1267_v2 = vmax.f32 %v1240_v25, 0.0 }
 0x304   : > { %1275 = vst [vmem:[%s2276_s22 + $0x30] sm:$0xff] %v1267_v2 }
 0x327   : > { %v1251_v60 = vpop.f32.mrf.mxu3 }
 0x328   : > { %v1252_v10 = vadd.f32 %v1251_v60, %v1189_v51 }
 0x32a   : > { %v1262_v59 = vmax.f32 %v1252_v10, 0.0 }
 0x32c   : > { %1270 = vst [vmem:[%s2276_s22 + $0x8] sm:$0xff] %v1262_v59 }
 0x32f   : > { %v1253_v56 = vpop.f32.mrf.mxu3 }
 0x330   : > { %v1254_v54 = vadd.f32 %v1253_v56, %v1194_v8 }
 0x332   : > { %v1264_v22 = vmax.f32 %v1254_v54, 0.0 }
 0x334   : > { %1272 = vst [vmem:[%s2276_s22 + $0x18] sm:$0xff] %v1264_v22 }
 0x337   : > { %v1256_v48 = vpop.f32.mrf.mxu3 }
 0x338   : > { %v1257_v28 = vadd.f32 %v1256_v48, %v1199_v43 }
 0x33a   : > { %v1266_v32 = vmax.f32 %v1257_v28, 0.0 }
 0x33c   : > { %1274 = vst [vmem:[%s2276_s22 + $0x28] sm:$0xff] %v1266_v32 }
 0x33f   : > { %v1258_v33 = vpop.f32.mrf.mxu3 }
 0x340   : > { %v1259_v20 = vadd.f32 %v1258_v33, %v1204_v26 }
 0x342   : > { %v1268_v13 = vmax.f32 %v1259_v20, 0.0 }
 0x344   : > { %1276 = vst [vmem:[%s2276_s22 + $0x38] sm:$0xff] %v1268_v13 }
 0x345   : > { %1645 = shalt.err (!%p1642_p5)
}
 0x346   : > { %s1699_s20 = smov 256   ;;  %s1700_s22 = smov 16  }
 0x347   : > { %1557 = dma.vmem_to_hbm [thread:$0]  (%p1781_p4), %s1293_s12, 1024, %s1295_s15, %s1278_s16, %s1699_s20, %s1699_s20, %s1700_s22  }
 0x348 PF: > { %p1563_p6 = scmp.ge.s32.totalorder %s1696_s29, 2  ;;  %s1309_s8 = sand.u32 1, %s1676_s24  }
 0x349   : > { %s1310_s10 = scalar_lea.sflag [#allocation3], %s1309_s8 }
 0x34a   : > { %p1560_p7 = pnand %p1563_p6, %p1788_p8 }
 0x34c   : > { %p1561_p9 = pneg %p1560_p7 }
 0x34e   : > { %1671 = dma.done.wait (%p1561_p9), %s1310_s10, 1024  }
 0x34f   : > { %1673 = vsyncadd (%p1561_p9), %s1310_s10, 4294966272  ;;  %s20_s29 = sadd.s32 1, %s1696_s29   ;;  %s2338_s24 = smov %s1680_s25 }
 0x350   : > { %p17_p10 = scmp.ge.s32.totalorder %s20_s29, 4   ;;  %s2339_s25 = smov %s1684_s26 }
 0x351   : > { %s2340_s26 = smov %s1794_s14  ;;  %s2341_s27 = smov %s1692_s28 }
 0x352   : > { %s2342_s28 = smov %s2344_s9  ;;  %19 = sbr.rel (!%p17_p10) target bundleno = 4 (0x4), region = 83 }
 0x357   :  { %1316 = vsyncpa [#allocation3], 1 }
 0x358   :  { %1318 = vsyncpa [#allocation3 + $0x1], 1 }

</bundles_post_ra>
